<compile_context>
chip_gen: v6e
topology: v6e:2x2x1
jax: 0.10.0
libtpu: 0.0.40
codegen_flags: <defaults>
</compile_context>

<pallas_src>
import jax
import jax.numpy as jnp
from jax.experimental import pallas as pl
from jax.experimental.pallas import tpu as pltpu

OUT_PAD = 16  # final layer padded from 15 -> 16 lanes (lane-dim == full array dim)


def generator_kernel(x_ref,
                     w0_ref, b0_ref,
                     w1_ref, b1_ref,
                     w2_ref, b2_ref,
                     w3_ref, b3_ref,
                     w4_ref, b4_ref,
                     o_ref):
    # x_ref is f32 (cast to bf16 here, in-kernel); w*_ref are bf16; b*_ref are f32.
    x = x_ref[...].astype(jnp.bfloat16)

    # hidden0: Linear(8, 32) + ReLU
    h = jnp.dot(x, w0_ref[...], preferred_element_type=jnp.float32)
    h = jnp.maximum(h + b0_ref[...], 0.0)

    # hidden1: Linear(32, 128) + ReLU (+ Dropout(0.3) == identity at eval)
    h = jnp.dot(h.astype(jnp.bfloat16), w1_ref[...],
                preferred_element_type=jnp.float32)
    h = jnp.maximum(h + b1_ref[...], 0.0)

    # hidden2: Linear(128, 64) + ReLU (+ Dropout(0.2) == identity at eval)
    h = jnp.dot(h.astype(jnp.bfloat16), w2_ref[...],
                preferred_element_type=jnp.float32)
    h = jnp.maximum(h + b2_ref[...], 0.0)

    # hidden3: Linear(64, 32) + ReLU (+ Dropout(0.2) == identity at eval)
    h = jnp.dot(h.astype(jnp.bfloat16), w3_ref[...],
                preferred_element_type=jnp.float32)
    h = jnp.maximum(h + b3_ref[...], 0.0)

    # out: Linear(32, 15->16 zero-padded) + Sigmoid; padded lane sliced off in wrapper.
    h = jnp.dot(h.astype(jnp.bfloat16), w4_ref[...],
                preferred_element_type=jnp.float32)
    o_ref[...] = jax.nn.sigmoid(h + b4_ref[...])


def _cdiv(a, b):
    return -(-a // b)


def _round_up(x, m):
    return (x + m - 1) // m * m


def _vmem_limit_bytes():
    """Pick a scoped-VMEM limit from the actual chip (64 MiB cap on 128 MiB parts,
    ~3/4 of physical on v7x's 64 MiB/TC)."""
    cap = 64 * 1024 * 1024
    try:
        info = pltpu.get_tpu_info()
        cap = int(getattr(info, "vmem_capacity_bytes", cap))
    except Exception:
        pass
    return int(min(64 * 1024 * 1024, cap * 3 // 4))


def generator_net(x, params, *, tile_b=4096):
    """x: (B, 8) float32; params: list of (W_(in,out) f32, b_(1,out) f32) pairs."""
    B, F = x.shape
    n_out = params[-1][1].shape[-1]  # 15

    # --- pack params: bf16 weights, f32 biases, last layer padded 15 -> 16 lanes ---
    w_list, b_list = [], []
    n_layers = len(params)
    for i, (w, b) in enumerate(params):
        if i == n_layers - 1 and w.shape[1] != OUT_PAD:
            w = jnp.pad(w, ((0, 0), (0, OUT_PAD - w.shape[1])))
            b = jnp.pad(b, ((0, 0), (0, OUT_PAD - b.shape[1])))
        w_list.append(w.astype(jnp.bfloat16))
        b_list.append(b.astype(jnp.float32))

    # --- batch tiling: derive the tile from B so padding waste stays < 16 rows/tile ---
    n_tiles = _cdiv(B, tile_b)
    if n_tiles == 1 and B >= 256:
        # Ensure >= 2 grid steps so the "parallel" axis can shard across the two
        # TensorCores on v7x; negligible overhead on single-TC v5e/v6e.
        n_tiles = 2
    tile_b_eff = max(16, _round_up(_cdiv(B, n_tiles), 16))  # multiple of 16 (bf16 rows)
    b_pad = n_tiles * tile_b_eff
    x_p = x.astype(jnp.float32)            # bf16 cast happens inside the kernel
    if b_pad != B:
        x_p = jnp.pad(x_p, ((0, b_pad - B), (0, 0)))

    flat = [x_p]
    for w, b in zip(w_list, b_list):
        flat += [w, b]

    grid = (n_tiles,)

    # x / out stream per batch tile; weights & biases resident (constant index_map).
    x_spec = pl.BlockSpec((tile_b_eff, F), lambda i: (i, 0))
    param_specs = []
    for w, b in zip(w_list, b_list):
        param_specs.append(pl.BlockSpec(w.shape, lambda i: (0, 0)))
        param_specs.append(pl.BlockSpec(b.shape, lambda i: (0, 0)))
    out_spec = pl.BlockSpec((tile_b_eff, OUT_PAD), lambda i: (i, 0))

    # Advisory cost hint for the XLA scheduler.
    flops = 2 * b_pad * sum(int(w.shape[0]) * int(w.shape[1]) for w in w_list)
    bytes_accessed = (x_p.size * 4 + b_pad * OUT_PAD * 4
                      + sum(w.size * 2 + b.size * 4
                            for w, b in zip(w_list, b_list)))
    cost = pl.CostEstimate(flops=flops,
                           transcendentals=b_pad * OUT_PAD,  # sigmoid exp
                           bytes_accessed=bytes_accessed)

    out = pl.pallas_call(
        generator_kernel,
        out_shape=jax.ShapeDtypeStruct((b_pad, OUT_PAD), jnp.float32),
        grid=grid,
        in_specs=[x_spec] + param_specs,
        out_specs=out_spec,
        compiler_params=pltpu.CompilerParams(
            dimension_semantics=("parallel",),     # megacore sharding on v7x
            vmem_limit_bytes=_vmem_limit_bytes(),  # per-chip scoped-VMEM limit
        ),
        cost_estimate=cost,
    )(*flat)

    return out[:B, :n_out]


def _init_linear(key, fan_in, fan_out):
    """Deterministic init mimicking PyTorch nn.Linear default (uniform +/- 1/sqrt(fan_in))."""
    kw, kb = jax.random.split(key)
    bound = 1.0 / jnp.sqrt(jnp.float32(fan_in))
    # Stored already transposed: (in_features, out_features)
    w = jax.random.uniform(kw, (fan_in, fan_out), jnp.float32, -bound, bound)
    b = jax.random.uniform(kb, (1, fan_out), jnp.float32, -bound, bound)
    return w, b


def _reference(x, params):
    """Pure-JAX reference with the same bf16-in / f32-accumulate numerics."""
    h = x.astype(jnp.bfloat16)
    n = len(params)
    for i, (w, b) in enumerate(params):
        h = jnp.dot(h, w.astype(jnp.bfloat16),
                    preferred_element_type=jnp.float32) + b
        if i < n - 1:
            h = jnp.maximum(h, 0.0).astype(jnp.bfloat16)
        else:
            h = jax.nn.sigmoid(h)
    return h


if __name__ == "__main__":
    key = jax.random.PRNGKey(0)
    k_x, k0, k1, k2, k3, k4 = jax.random.split(key, 6)

    batch = 8
    n_features = 8

    x = jax.random.normal(k_x, (batch, n_features), jnp.float32)

    layer_dims = [(8, 32), (32, 128), (128, 64), (64, 32), (32, 15)]
    keys = [k0, k1, k2, k3, k4]
    params = [_init_linear(k, fi, fo) for k, (fi, fo) in zip(keys, layer_dims)]

    out = generator_net(x, params)
    out = jax.block_until_ready(out)

    ref = _reference(x, params)
    assert out.shape == (batch, 15), out.shape
    assert jnp.allclose(out, ref, atol=1e-3, rtol=1e-3), "mismatch vs JAX reference"

    print("KERNEL_OK")
</pallas_src>

<mosaic_0001>
module attributes {stable_mosaic.version = 11 : i64} {
  func.func @generator_kernel(%arg0: i32, %arg1: memref<16x8xf32, #tpu.memory_space<vmem>>, %arg2: memref<8x32xbf16, #tpu.memory_space<vmem>>, %arg3: memref<1x32xf32, #tpu.memory_space<vmem>>, %arg4: memref<32x128xbf16, #tpu.memory_space<vmem>>, %arg5: memref<1x128xf32, #tpu.memory_space<vmem>>, %arg6: memref<128x64xbf16, #tpu.memory_space<vmem>>, %arg7: memref<1x64xf32, #tpu.memory_space<vmem>>, %arg8: memref<64x32xbf16, #tpu.memory_space<vmem>>, %arg9: memref<1x32xf32, #tpu.memory_space<vmem>>, %arg10: memref<32x16xbf16, #tpu.memory_space<vmem>>, %arg11: memref<1x16xf32, #tpu.memory_space<vmem>>, %arg12: memref<16x16xf32, #tpu.memory_space<vmem>>) attributes {dimension_semantics = [#tpu.dimension_semantics<parallel>], iteration_bounds = array<i64: 1>, scalar_prefetch = 0 : i64, scratch_operands = 0 : i64, tpu.core_type = #tpu.core_type<tc>, window_params = [{transform_indices = @transform_0, window_bounds = array<i64: 16, 8>}, {pipeline_mode = #tpu.pipeline_mode<synchronous>, transform_indices = @transform_1, window_bounds = array<i64: 8, 32>}, {pipeline_mode = #tpu.pipeline_mode<synchronous>, transform_indices = @transform_2, window_bounds = array<i64: 1, 32>}, {pipeline_mode = #tpu.pipeline_mode<synchronous>, transform_indices = @transform_3, window_bounds = array<i64: 32, 128>}, {pipeline_mode = #tpu.pipeline_mode<synchronous>, transform_indices = @transform_4, window_bounds = array<i64: 1, 128>}, {pipeline_mode = #tpu.pipeline_mode<synchronous>, transform_indices = @transform_5, window_bounds = array<i64: 128, 64>}, {pipeline_mode = #tpu.pipeline_mode<synchronous>, transform_indices = @transform_6, window_bounds = array<i64: 1, 64>}, {pipeline_mode = #tpu.pipeline_mode<synchronous>, transform_indices = @transform_7, window_bounds = array<i64: 64, 32>}, {pipeline_mode = #tpu.pipeline_mode<synchronous>, transform_indices = @transform_8, window_bounds = array<i64: 1, 32>}, {pipeline_mode = #tpu.pipeline_mode<synchronous>, transform_indices = @transform_9, window_bounds = array<i64: 32, 16>}, {pipeline_mode = #tpu.pipeline_mode<synchronous>, transform_indices = @transform_10, window_bounds = array<i64: 1, 16>}, {transform_indices = @transform_11, window_bounds = array<i64: 16, 16>}]} {
    %c0 = arith.constant 0 : index
    %c0_0 = arith.constant 0 : index
    %0 = vector.load %arg1[%c0, %c0_0] : memref<16x8xf32, #tpu.memory_space<vmem>>, vector<16x8xf32>
    %1 = arith.truncf %0 : vector<16x8xf32> to vector<16x8xbf16>
    %c0_1 = arith.constant 0 : index
    %c0_2 = arith.constant 0 : index
    %2 = vector.load %arg2[%c0_1, %c0_2] : memref<8x32xbf16, #tpu.memory_space<vmem>>, vector<8x32xbf16>
    %cst = arith.constant dense<0.000000e+00> : vector<16x32xf32>
    %3 = tpu.matmul %1, %2, %cst {dimension_numbers = #tpu.dot_dimension_numbers<[1], [0], [0], [1], [0, 0, 1, 1], [], []>} : vector<16x8xbf16>, vector<8x32xbf16>, vector<16x32xf32> -> vector<16x32xf32>
    %c0_3 = arith.constant 0 : index
    %c0_4 = arith.constant 0 : index
    %4 = vector.load %arg3[%c0_3, %c0_4] : memref<1x32xf32, #tpu.memory_space<vmem>>, vector<1x32xf32>
    %5 = vector.broadcast %4 : vector<1x32xf32> to vector<16x32xf32>
    %6 = arith.addf %3, %5 : vector<16x32xf32>
    %cst_5 = arith.constant 0.000000e+00 : f32
    %7 = vector.broadcast %cst_5 : f32 to vector<16x32xf32>
    %8 = arith.maximumf %6, %7 : vector<16x32xf32>
    %9 = arith.truncf %8 : vector<16x32xf32> to vector<16x32xbf16>
    %c0_6 = arith.constant 0 : index
    %c0_7 = arith.constant 0 : index
    %10 = vector.load %arg4[%c0_6, %c0_7] : memref<32x128xbf16, #tpu.memory_space<vmem>>, vector<32x128xbf16>
    %cst_8 = arith.constant dense<0.000000e+00> : vector<16x128xf32>
    %11 = tpu.matmul %9, %10, %cst_8 {dimension_numbers = #tpu.dot_dimension_numbers<[1], [0], [0], [1], [0, 0, 1, 1], [], []>} : vector<16x32xbf16>, vector<32x128xbf16>, vector<16x128xf32> -> vector<16x128xf32>
    %c0_9 = arith.constant 0 : index
    %c0_10 = arith.constant 0 : index
    %12 = vector.load %arg5[%c0_9, %c0_10] : memref<1x128xf32, #tpu.memory_space<vmem>>, vector<1x128xf32>
    %13 = vector.broadcast %12 : vector<1x128xf32> to vector<16x128xf32>
    %14 = arith.addf %11, %13 : vector<16x128xf32>
    %cst_11 = arith.constant 0.000000e+00 : f32
    %15 = vector.broadcast %cst_11 : f32 to vector<16x128xf32>
    %16 = arith.maximumf %14, %15 : vector<16x128xf32>
    %17 = arith.truncf %16 : vector<16x128xf32> to vector<16x128xbf16>
    %c0_12 = arith.constant 0 : index
    %c0_13 = arith.constant 0 : index
    %18 = vector.load %arg6[%c0_12, %c0_13] : memref<128x64xbf16, #tpu.memory_space<vmem>>, vector<128x64xbf16>
    %cst_14 = arith.constant dense<0.000000e+00> : vector<16x64xf32>
    %19 = tpu.matmul %17, %18, %cst_14 {dimension_numbers = #tpu.dot_dimension_numbers<[1], [0], [0], [1], [0, 0, 1, 1], [], []>} : vector<16x128xbf16>, vector<128x64xbf16>, vector<16x64xf32> -> vector<16x64xf32>
    %c0_15 = arith.constant 0 : index
    %c0_16 = arith.constant 0 : index
    %20 = vector.load %arg7[%c0_15, %c0_16] : memref<1x64xf32, #tpu.memory_space<vmem>>, vector<1x64xf32>
    %21 = vector.broadcast %20 : vector<1x64xf32> to vector<16x64xf32>
    %22 = arith.addf %19, %21 : vector<16x64xf32>
    %cst_17 = arith.constant 0.000000e+00 : f32
    %23 = vector.broadcast %cst_17 : f32 to vector<16x64xf32>
    %24 = arith.maximumf %22, %23 : vector<16x64xf32>
    %25 = arith.truncf %24 : vector<16x64xf32> to vector<16x64xbf16>
    %c0_18 = arith.constant 0 : index
    %c0_19 = arith.constant 0 : index
    %26 = vector.load %arg8[%c0_18, %c0_19] : memref<64x32xbf16, #tpu.memory_space<vmem>>, vector<64x32xbf16>
    %cst_20 = arith.constant dense<0.000000e+00> : vector<16x32xf32>
    %27 = tpu.matmul %25, %26, %cst_20 {dimension_numbers = #tpu.dot_dimension_numbers<[1], [0], [0], [1], [0, 0, 1, 1], [], []>} : vector<16x64xbf16>, vector<64x32xbf16>, vector<16x32xf32> -> vector<16x32xf32>
    %c0_21 = arith.constant 0 : index
    %c0_22 = arith.constant 0 : index
    %28 = vector.load %arg9[%c0_21, %c0_22] : memref<1x32xf32, #tpu.memory_space<vmem>>, vector<1x32xf32>
    %29 = vector.broadcast %28 : vector<1x32xf32> to vector<16x32xf32>
    %30 = arith.addf %27, %29 : vector<16x32xf32>
    %cst_23 = arith.constant 0.000000e+00 : f32
    %31 = vector.broadcast %cst_23 : f32 to vector<16x32xf32>
    %32 = arith.maximumf %30, %31 : vector<16x32xf32>
    %33 = arith.truncf %32 : vector<16x32xf32> to vector<16x32xbf16>
    %c0_24 = arith.constant 0 : index
    %c0_25 = arith.constant 0 : index
    %34 = vector.load %arg10[%c0_24, %c0_25] : memref<32x16xbf16, #tpu.memory_space<vmem>>, vector<32x16xbf16>
    %cst_26 = arith.constant dense<0.000000e+00> : vector<16x16xf32>
    %35 = tpu.matmul %33, %34, %cst_26 {dimension_numbers = #tpu.dot_dimension_numbers<[1], [0], [0], [1], [0, 0, 1, 1], [], []>} : vector<16x32xbf16>, vector<32x16xbf16>, vector<16x16xf32> -> vector<16x16xf32>
    %c0_27 = arith.constant 0 : index
    %c0_28 = arith.constant 0 : index
    %36 = vector.load %arg11[%c0_27, %c0_28] : memref<1x16xf32, #tpu.memory_space<vmem>>, vector<1x16xf32>
    %37 = vector.broadcast %36 : vector<1x16xf32> to vector<16x16xf32>
    %38 = arith.addf %35, %37 : vector<16x16xf32>
    %39 = arith.negf %38 : vector<16x16xf32>
    %40 = math.exp %39 : vector<16x16xf32>
    %cst_29 = arith.constant 1.000000e+00 : f32
    %41 = vector.broadcast %cst_29 : f32 to vector<16x16xf32>
    %42 = arith.addf %41, %40 : vector<16x16xf32>
    %43 = arith.divf %41, %42 : vector<16x16xf32>
    %c0_30 = arith.constant 0 : index
    %c0_31 = arith.constant 0 : index
    %44 = vector.load %arg12[%c0_30, %c0_31] : memref<16x16xf32, #tpu.memory_space<vmem>>, vector<16x16xf32>
    tpu.vector_store %arg12[%c0_30, %c0_31], %43 {strides = array<i32>} : memref<16x16xf32, #tpu.memory_space<vmem>>, vector<16x16xf32>,
    return
  }
  func.func @transform_0(%arg0: i32) -> (i32, i32) {
    %c0_i32 = arith.constant 0 : i32
    %c0_i32_0 = arith.constant 0 : i32
    return %arg0, %c0_i32 : i32, i32
  }
  func.func @transform_1(%arg0: i32) -> (i32, i32) {
    %c0_i32 = arith.constant 0 : i32
    %c0_i32_0 = arith.constant 0 : i32
    %c0_i32_1 = arith.constant 0 : i32
    return %c0_i32, %c0_i32_0 : i32, i32
  }
  func.func @transform_2(%arg0: i32) -> (i32, i32) {
    %c0_i32 = arith.constant 0 : i32
    %c0_i32_0 = arith.constant 0 : i32
    %c0_i32_1 = arith.constant 0 : i32
    return %c0_i32, %c0_i32_0 : i32, i32
  }
  func.func @transform_3(%arg0: i32) -> (i32, i32) {
    %c0_i32 = arith.constant 0 : i32
    %c0_i32_0 = arith.constant 0 : i32
    %c0_i32_1 = arith.constant 0 : i32
    return %c0_i32, %c0_i32_0 : i32, i32
  }
  func.func @transform_4(%arg0: i32) -> (i32, i32) {
    %c0_i32 = arith.constant 0 : i32
    %c0_i32_0 = arith.constant 0 : i32
    %c0_i32_1 = arith.constant 0 : i32
    return %c0_i32, %c0_i32_0 : i32, i32
  }
  func.func @transform_5(%arg0: i32) -> (i32, i32) {
    %c0_i32 = arith.constant 0 : i32
    %c0_i32_0 = arith.constant 0 : i32
    %c0_i32_1 = arith.constant 0 : i32
    return %c0_i32, %c0_i32_0 : i32, i32
  }
  func.func @transform_6(%arg0: i32) -> (i32, i32) {
    %c0_i32 = arith.constant 0 : i32
    %c0_i32_0 = arith.constant 0 : i32
    %c0_i32_1 = arith.constant 0 : i32
    return %c0_i32, %c0_i32_0 : i32, i32
  }
  func.func @transform_7(%arg0: i32) -> (i32, i32) {
    %c0_i32 = arith.constant 0 : i32
    %c0_i32_0 = arith.constant 0 : i32
    %c0_i32_1 = arith.constant 0 : i32
    return %c0_i32, %c0_i32_0 : i32, i32
  }
  func.func @transform_8(%arg0: i32) -> (i32, i32) {
    %c0_i32 = arith.constant 0 : i32
    %c0_i32_0 = arith.constant 0 : i32
    %c0_i32_1 = arith.constant 0 : i32
    return %c0_i32, %c0_i32_0 : i32, i32
  }
  func.func @transform_9(%arg0: i32) -> (i32, i32) {
    %c0_i32 = arith.constant 0 : i32
    %c0_i32_0 = arith.constant 0 : i32
    %c0_i32_1 = arith.constant 0 : i32
    return %c0_i32, %c0_i32_0 : i32, i32
  }
  func.func @transform_10(%arg0: i32) -> (i32, i32) {
    %c0_i32 = arith.constant 0 : i32
    %c0_i32_0 = arith.constant 0 : i32
    %c0_i32_1 = arith.constant 0 : i32
    return %c0_i32, %c0_i32_0 : i32, i32
  }
  func.func @transform_11(%arg0: i32) -> (i32, i32) {
    %c0_i32 = arith.constant 0 : i32
    %c0_i32_0 = arith.constant 0 : i32
    return %arg0, %c0_i32 : i32, i32
  }
}

</mosaic_0001>

<bundles_post_ra>
// kernel: tpu_custom_call.1
= control target key start
LH: loop header
LB: loop body
LE: loop exit
PB: predicated region body
PF: predicated region fallthrough
CT: control target
= control target key end

     0   :  { %vm55_vm0 = vcmask 1043456   ;;  %v628_v2 = vmov 0.0   ;;  %vm629_vm1 = vmmov 0   ;;  %vm51_vm2 = vcmask 64512   ;;  %s797_s0 = inlined_call_operand.vmem [shape: f32[16,8], index: 0, kind: input, shape index: {}]   ;;  %s798_s1 = inlined_call_operand.vmem [shape: bf16[8,32], index: 1, kind: input, shape index: {}]   ;;  %s799_s2 = inlined_call_operand.vmem [shape: f32[1,32], index: 2, kind: input, shape index: {}]   ;;  %s800_s3 = inlined_call_operand.vmem [shape: bf16[32,128], index: 3, kind: input, shape index: {}]   ;;  %s801_s4 = inlined_call_operand.vmem [shape: f32[1,128], index: 4, kind: input, shape index: {}]   ;;  %s802_s5 = inlined_call_operand.vmem [shape: bf16[128,64], index: 5, kind: input, shape index: {}]   ;;  %s803_s6 = inlined_call_operand.vmem [shape: f32[1,64], index: 6, kind: input, shape index: {}]   ;;  %s804_s7 = inlined_call_operand.vmem [shape: bf16[64,32], index: 7, kind: input, shape index: {}]   ;;  %s805_s8 = inlined_call_operand.vmem [shape: f32[1,32], index: 8, kind: input, shape index: {}]   ;;  %s806_s9 = inlined_call_operand.vmem [shape: bf16[32,16], index: 9, kind: input, shape index: {}]   ;;  %s807_s10 = inlined_call_operand.vmem [shape: f32[1,16], index: 10, kind: input, shape index: {}]   ;;  %s808_s11 = inlined_call_operand.hbm [shape: f32[16,16], index: 11, kind: output, shape index: {}]  }
   0x1   :  { %v43_v0 = vld [vmem:[%s798_s1] sm:$0xf]  ;;  %523 = vmatprep.subr.bf16.mxu0 %v628_v2  ;;  %525 = vmatprep.mubr.msk.bf16.mxu0 %vm629_vm1, %v628_v2  ;;  %v41_v4 = vld [vmem:[%s797_s0 + $0x8] sm:$0xff] }
   0x2   :  { %v40_v1 = vld [vmem:[%s797_s0] sm:$0xff]  ;;  %v57_v3 = vsel %vm55_vm0, %v43_v0, 0  ;;  %529 = vmatprep.subr.bf16.mxu1 %v628_v2  ;;  %533 = vmatprep.mubr.msk.bf16.mxu1 %vm629_vm1, %v628_v2 }
   0x3   :  { %524 = vmatpush3.bf16.msra.mxu0 %v57_v3  ;;  %v42_v5 = vpack.c.bf16 %v41_v4, %v40_v1 }
   0x4   :  { %537 = vmatprep.subr.bf16.mxu0 %v628_v2 }
   0x6   :  { %526 = vmatmul.mubr.msk.bf16.vlgmr.msra.gmra.mxu0 %vm51_vm2, %v42_v5 }
   0x7   :  { %553 = vmatprep.mubr.msk.bf16.mxu0 %vm629_vm1, %v628_v2 }
   0x8   :  { %16 = vsyncpa [#allocation3], 0  ;;  %v582_v6 = vld [vmem:[%s800_s3 + $0x8] sm:$0xff]   ;;  %v583_v7 = vld [vmem:[%s800_s3] sm:$0xff]   ;;  %vm126_vm3 = vcmask 261120   ;;  %vm328_vm4 = vcmask 523264  }
   0x9   :  { %530 = vmatpush3.bf16.msra.mxu1 %v582_v6  ;;  %v584_v8 = vld [vmem:[%s802_s5 + $0x38] sm:$0xff]   ;;  %v585_v9 = vld [vmem:[%s802_s5 + $0x30] sm:$0xff]   ;;  %v586_v10 = vld [vmem:[%s802_s5 + $0x28] sm:$0xff]   ;;  %vm455_vm5 = vcmask 130048  }
   0xa   :  { %531 = vmatprep.subr.bf16.mxu1 %v628_v2  ;;  %538 = vmatpush3.bf16.msra.mxu0 %v584_v8  ;;  %v587_v11 = vld [vmem:[%s802_s5 + $0x20] sm:$0xff]   ;;  %v588_v12 = vld [vmem:[%s802_s5 + $0x18] sm:$0xff]   ;;  %v589_v23 = vld [vmem:[%s802_s5 + $0x10] sm:$0xff]  }
   0xb   :  { %539 = vmatprep.subr.bf16.mxu0 %v628_v2  ;;  %v474_v13 = vld [vmem:[%s799_s2] ss:$0 sm:$0xff]  ;;  %v590_v24 = vld [vmem:[%s802_s5 + $0x8] sm:$0xff]   ;;  %v592_v26 = vld [vmem:[%s804_s7 + $0x18] sm:$0xff]  }
   0xc   :  { %v591_v25 = vld [vmem:[%s802_s5] sm:$0xff]   ;;  %v593_v37 = vld [vmem:[%s804_s7 + $0x10] sm:$0xff]   ;;  %v594_v38 = vld [vmem:[%s804_s7 + $0x8] sm:$0xff]  }
   0xd   :  { %532 = vmatpush3.bf16.msra.mxu1 %v583_v7  ;;  %v476_v27 = vld [vmem:[%s801_s4] ss:$0 sm:$0xff]  ;;  %v596_v50 = vld [vmem:[%s806_s9 + $0x8] sm:$0xff]  }
   0xe   :  { %557 = vmatprep.subr.bf16.mxu1 %v628_v2  ;;  %540 = vmatpush3.bf16.msra.mxu0 %v585_v9  ;;  %v595_v39 = vld [vmem:[%s804_s7] sm:$0xff]  }
   0xf   :  { %541 = vmatprep.subr.bf16.mxu0 %v628_v2  ;;  %v480_v40 = vld [vmem:[%s803_s6] ss:$0 sm:$0xff] }
  0x10   :  { %v597_v51 = vld [vmem:[%s806_s9] sm:$0xff]  }
  0x11   :  { %v489_v52 = vld [vmem:[%s805_s8] ss:$0 sm:$0xff]  ;;  %s630_s8 = smov [#allocation2]  }
  0x12   :  { %542 = vmatpush3.bf16.msra.mxu0 %v586_v10  ;;  %v495_v62 = vld [vmem:[%s807_s10] ss:$0 sm:$0xff]  ;;  %s463_s9 = sshll.u32 %s630_s8, 4  ;;  %s464_s9 = int_to_ptr.vmem [resolvable:$true] %s463_s9 }
  0x13   :  { %543 = vmatprep.subr.bf16.mxu0 %v628_v2  ;;  %s606_s10 = scalar_lea.vmem %s464_s9, 256  ;;  %p611_p1 = scmp.lt.s32.totalorder %s464_s9, %s464_s9 }
  0x14   :  { %p607_p0 = scmp.ne.s32.totalorder %s464_s9, %s606_s10  ;;  %p612_p2 = scmp.lt.s32.totalorder %s606_s10, %s606_s10 }
  0x16   :  { %544 = vmatpush3.bf16.msra.mxu0 %v587_v11  ;;  %p613_p3 = por %p612_p2, %p611_p1 }
  0x17   :  { %545 = vmatprep.subr.bf16.mxu0 %v628_v2 }
  0x18   :  { %p614_p4 = pnand %p613_p3, %p607_p0 }
  0x1a   :  { %546 = vmatpush3.bf16.msra.mxu0 %v588_v12 }
  0x1b   :  { %547 = vmatprep.subr.bf16.mxu0 %v628_v2 }
  0x1e   :  { %548 = vmatpush3.bf16.msra.mxu0 %v589_v23 }
  0x1f   :  { %549 = vmatprep.subr.bf16.mxu0 %v628_v2 }
  0x22   :  { %550 = vmatpush3.bf16.msra.mxu0 %v590_v24 }
  0x23   :  { %551 = vmatprep.subr.bf16.mxu0 %v628_v2 }
  0x26   :  { %552 = vmatpush3.bf16.msra.mxu0 %v591_v25 }
  0xc6   :  { %v93_v14 = vpop.f32.mrf.mxu0 }
  0xc7   :  { %v94_v16 = vadd.f32 %v474_v13, %v93_v14 }
  0xc8   :  { %v527_v15 = vpop.f32.mrf.mxu0 }
  0xc9   :  { %v100_v20 = vmax.f32 %v94_v16, 0.0 }
  0xca   :  { %v96_v17 = vpop.f32.mrf.mxu0 }
  0xcb   :  { %v97_v18 = vadd.f32 %v474_v13, %v96_v17 }
  0xcc   :  { %v528_v19 = vpop.f32.mrf.mxu0 }
  0xcd   :  { %v101_v21 = vmax.f32 %v97_v18, 0.0 }
  0xcf   :  { %v102_v22 = vpack.c.bf16 %v101_v21, %v100_v20 }
  0xd1   :  { %534 = vmatmul.mubr.msk.bf16.vlgmr.msra.gmra.mxu1 %vm126_vm3, %v102_v22 }
  0xd2   :  { %565 = vmatprep.mubr.msk.bf16.mxu1 %vm629_vm1, %v628_v2  ;;  %558 = vmatpush3.bf16.msra.mxu1 %v592_v26 }
  0xd3   :  { %559 = vmatprep.subr.bf16.mxu1 %v628_v2 }
  0xd6   :  { %560 = vmatpush3.bf16.msra.mxu1 %v593_v37 }
  0xd7   :  { %561 = vmatprep.subr.bf16.mxu1 %v628_v2 }
  0xda   :  { %562 = vmatpush3.bf16.msra.mxu1 %v594_v38 }
  0xdb   :  { %563 = vmatprep.subr.bf16.mxu1 %v628_v2 }
  0xde   :  { %564 = vmatpush3.bf16.msra.mxu1 %v595_v39 }
  0xdf   :  { %569 = vmatprep.subr.bf16.mxu1 %v628_v2 }
 0x191   :  { %v164_v28 = vpop.f32.mrf.mxu1 }
 0x192   :  { %v165_v30 = vadd.f32 %v476_v27, %v164_v28 }
 0x193   :  { %v535_v29 = vpop.f32.mrf.mxu1 }
 0x194   :  { %v171_v34 = vmax.f32 %v165_v30, 0.0 }
 0x195   :  { %v167_v31 = vpop.f32.mrf.mxu1 }
 0x196   :  { %v168_v32 = vadd.f32 %v476_v27, %v167_v31 }
 0x197   :  { %v536_v33 = vpop.f32.mrf.mxu1 }
 0x198   :  { %v172_v35 = vmax.f32 %v168_v32, 0.0 }
 0x19a   :  { %v173_v36 = vpack.c.bf16 %v172_v35, %v171_v34 }
 0x19c   :  { %554 = vmatmul.mubr.bf16.vlgmr.msra.gmra.mxu0 %v173_v36 }
 0x25c   :  { %v279_v41 = vpop.f32.mrf.mxu0 }
 0x25d   :  { %v280_v43 = vadd.f32 %v480_v40, %v279_v41 }
 0x25e   :  { %v555_v42 = vpop.f32.mrf.mxu0 }
 0x25f   :  { %v286_v47 = vmax.f32 %v280_v43, 0.0 }
 0x260   :  { %v282_v44 = vpop.f32.mrf.mxu0 }
 0x261   :  { %v283_v45 = vadd.f32 %v480_v40, %v282_v44 }
 0x262   :  { %v556_v46 = vpop.f32.mrf.mxu0 }
 0x263   :  { %v287_v48 = vmax.f32 %v283_v45, 0.0 }
 0x265   :  { %v288_v49 = vpack.c.bf16 %v287_v48, %v286_v47 }
 0x267   :  { %566 = vmatmul.mubr.msk.bf16.vlgmr.msra.gmra.mxu1 %vm328_vm4, %v288_v49 }
 0x268   :  { %573 = vmatprep.mubr.msk.bf16.mxu1 %vm629_vm1, %v628_v2  ;;  %570 = vmatpush3.bf16.msra.mxu1 %v596_v50 }
 0x269   :  { %571 = vmatprep.subr.bf16.mxu1 %v628_v2 }
 0x26c   :  { %572 = vmatpush3.bf16.msra.mxu1 %v597_v51 }
 0x327   :  { %v366_v53 = vpop.f32.mrf.mxu1 }
 0x328   :  { %v367_v55 = vadd.f32 %v489_v52, %v366_v53 }
 0x329   :  { %v567_v54 = vpop.f32.mrf.mxu1 }
 0x32a   :  { %v373_v59 = vmax.f32 %v367_v55, 0.0 }
 0x32b   :  { %v369_v56 = vpop.f32.mrf.mxu1 }
 0x32c   :  { %v370_v57 = vadd.f32 %v489_v52, %v369_v56 }
 0x32d   :  { %v568_v58 = vpop.f32.mrf.mxu1 }
 0x32e   :  { %v374_v60 = vmax.f32 %v370_v57, 0.0 }
 0x330   :  { %v375_v61 = vpack.c.bf16 %v374_v60, %v373_v59 }
 0x332   :  { %574 = vmatmul.mubr.msk.bf16.vlgmr.msra.gmra.mxu1 %vm126_vm3, %v375_v61 }
 0x3f2   :  { %v436_v63 = vpop.f32.mrf.mxu1 }
 0x3f3   :  { %v437_v0 = vadd.f32 %v495_v62, %v436_v63 }
 0x3f4   :  { %v575_v1 = vpop.f32.mrf.mxu1 }
 0x3f5   :  { %v499_v2 = vmul.f32 -1.442695, %v437_v0 }
 0x3f6   :  { %v439_v3 = vpop.f32.mrf.mxu1 }
 0x3f7   :  { %598 = vpow2.f32 %v499_v2  ;;  %v440_v4 = vadd.f32 %v495_v62, %v439_v3 }
 0x3f8   :  { %v576_v5 = vpop.f32.mrf.mxu1 }
 0x3f9   :  { %v500_v6 = vmul.f32 -1.442695, %v440_v4 }
 0x3fb   :  { %600 = vpow2.f32 %v500_v6 }
 0x404   :  { %v599_v7 = vpop.eup %598 }
 0x405   :  { %v449_v8 = vadd.f32 1.0, %v599_v7 }
 0x407   :  { %602 = vrcp.f32 %v449_v8 }
 0x408   :  { %v601_v9 = vpop.eup %600 }
 0x409   :  { %v450_v10 = vadd.f32 1.0, %v601_v9 }
 0x40b   :  { %604 = vrcp.f32 %v450_v10 }
 0x414   :  { %v603_v11 = vpop.eup %602 }
 0x415   :  { %456 = vst.msk [vmem:[#allocation2] sm:$0xff] %vm455_vm5, %v603_v11 }
 0x418   :  { %v605_v12 = vpop.eup %604 }
 0x419   :  { %457 = vst.msk [vmem:[#allocation2 + $0x8] sm:$0xff] %vm455_vm5, %v605_v12 }
 0x41a   :  { %617 = shalt.err (!%p614_p4)
}
 0x41b   :  { %s631_s16 = smov 128   ;;  %s632_s17 = smov 8  }
 0x41c   :  { %469 = dma.vmem_to_hbm [thread:$0]  %s464_s9, 256, %s808_s11, [#allocation3], %s631_s16, %s631_s16, %s632_s17  }
 0x41d   :  { %626 = dma.done.wait [#allocation3], 256  }
 0x41e   :  { %627 = vsyncadd [#allocation3], 4294967040 }
 0x41f   :  { %473 = vsyncpa [#allocation3], 1 }

</bundles_post_ra>
